<compile_context>
chip_gen: v5e
topology: v5e:2x2
jax: 0.10.0
libtpu: 0.0.40
codegen_flags: <defaults>
</compile_context>

<pallas_src>
import jax
import jax.numpy as jnp
from jax.experimental import pallas as pl
from jax.experimental.pallas import tpu as pltpu


def _round_up(v, m):
    return ((v + m - 1) // m) * m


def _vmem_budget_bytes():
    """Per-core VMEM budget: ~75% of physical, capped at 100 MiB.

    v5e/v6e (128 MiB physical) -> ~96 MiB; v7x (64 MiB per TC) -> ~48 MiB.
    """
    try:
        cap = int(pltpu.get_tpu_info().vmem_capacity_bytes)
    except Exception:
        cap = 64 * 1024 * 1024  # conservative (v7x-sized) fallback
    return min((cap * 3) // 4, 100 * 1024 * 1024)


def _plan_tiles(n, h_pad, tm_req, tk_req, a_bytes, out_bytes, budget):
    """Pick (tm, tk, xw_resident) so kernel-2 VMEM usage fits the budget."""
    # tm multiple of 32 (covers bf16/fp8 sublane packing), tk multiple of 128.
    tm = max(32, _round_up(min(tm_req, _round_up(n, 32)), 32))
    tk = max(128, _round_up(min(tk_req, _round_up(n, 128)), 128))

    def usage(tm_, tk_, resident):
        npad_k = _round_up(n, tk_)
        u = 2 * tm_ * tk_ * a_bytes          # A_hat double buffer
        u += 2 * tm_ * h_pad * out_bytes     # output double buffer
        u += tm_ * h_pad * 4                 # f32 accumulator scratch
        if resident:
            u += 2 * npad_k * h_pad * 2      # resident bf16 XW (conservative 2x)
        else:
            u += 2 * tk_ * h_pad * 2         # streamed XW double buffer
        return u

    # Prefer the resident-XW layout: it removes the grid_m * N * H re-read.
    xw_resident = usage(tm, tk, True) <= budget
    while usage(tm, tk, xw_resident) > budget and (tk > 128 or tm > 32):
        if tk > 128:
            tk = max(128, _round_up(tk // 2, 128))
        else:
            tm = max(32, _round_up(tm // 2, 32))
    return tm, tk, xw_resident


# ---------------------------------------------------------------------------
# Kernel 1 (only used for large c_in): XW = x @ W, bf16 inputs, f32 acc.
# ---------------------------------------------------------------------------
def _xw_kernel(x_ref, w_ref, o_ref, acc_ref):
    c = pl.program_id(1)

    @pl.when(c == 0)
    def _():
        acc_ref[...] = jnp.zeros_like(acc_ref)

    acc_ref[...] += jnp.dot(
        x_ref[...], w_ref[...], preferred_element_type=jnp.float32
    )

    @pl.when(c == pl.num_programs(1) - 1)
    def _():
        o_ref[...] = acc_ref[...].astype(o_ref.dtype)


# ---------------------------------------------------------------------------
# Kernel 2: tiled aggregation + bias + softmax over the feature dim
#   acc[i-tile, :] += A_hat[i-tile, k-tile] @ XW[k-tile, :]   (f32 accumulator)
#   on the last k-step: softmax(acc + bias) and store (lane-dense output)
# XW is either VMEM-resident (sliced in-kernel) or streamed per k-step.
# ---------------------------------------------------------------------------
def _make_agg_softmax_kernel(xw_resident, tk):
    def kernel(a_ref, xw_ref, b_ref, o_ref, acc_ref):
        k = pl.program_id(1)

        @pl.when(k == 0)
        def _():
            acc_ref[...] = jnp.zeros_like(acc_ref)

        if xw_resident:
            start = pl.multiple_of(k * tk, tk)
            xw_blk = xw_ref[pl.ds(start, tk), :]
        else:
            xw_blk = xw_ref[...]

        acc_ref[...] += jnp.dot(
            a_ref[...], xw_blk, preferred_element_type=jnp.float32
        )

        @pl.when(k == pl.num_programs(1) - 1)
        def _():
            # Padded feature columns carry a -1e30 bias, so they contribute
            # exp(~-1e30) == 0 to the softmax and vanish.
            h = acc_ref[...] + b_ref[...]
            m = jnp.max(h, axis=1, keepdims=True)
            e = jnp.exp(h - m)
            s = jnp.sum(e, axis=1, keepdims=True)
            # Exact divide: epilogue-only, hidden under the next A_hat DMA,
            # keeps rows normalized to f32 precision.
            o_ref[...] = (e / s).astype(o_ref.dtype)

    return kernel


def gcn_encoder_pallas(x, edge_index, edge_weight, weight, bias, *,
                       tm=None, tk=None, a_hat_dtype=jnp.bfloat16,
                       out_dtype=jnp.float32):
    """Forward pass of GCN_Encoder.

    x:           [N, C_in] float32 node features
    edge_index:  [2, E]    int32   (row = source, col = target)
    edge_weight: [E]       float32
    weight:      [C_in, H] float32 (GCNConv linear weight, no bias inside lin)
    bias:        [H]       float32 (GCNConv bias)
    returns:     [N, H]    out_dtype (default float32)

    a_hat_dtype: bf16 by default. On v7x, jnp.float8_e4m3fn may be passed to
    halve the dominant N^2 HBM stream (not supported on v5e/v6e MXUs).
    """
    n, c_in = x.shape
    h_dim = weight.shape[1]
    h_pad = _round_up(h_dim, 128)        # lane-dense feature dim

    budget = _vmem_budget_bytes()
    a_bytes = jnp.dtype(a_hat_dtype).itemsize
    out_bytes = jnp.dtype(out_dtype).itemsize
    tm_req = 512 if tm is None else tm
    tk_req = 1024 if tk is None else tk
    tm, tk, xw_resident = _plan_tiles(n, h_pad, tm_req, tk_req,
                                      a_bytes, out_bytes, budget)

    npad_m = _round_up(n, tm)            # padded rows of A_hat / output
    npad_k = _round_up(n, tk)            # padded contraction dim

    row = edge_index[0]
    col = edge_index[1]

    # --- glue: gcn_norm with add_self_loops=False (scatter in plain JAX) ---
    deg = jnp.zeros((n,), jnp.float32).at[col].add(edge_weight)
    deg_inv_sqrt = jnp.where(deg > 0, jax.lax.rsqrt(jnp.maximum(deg, 1e-30)), 0.0)
    norm = deg_inv_sqrt[row] * edge_weight * deg_inv_sqrt[col]

    # Dense normalized adjacency, scattered directly at the kernel dtype
    # (avoids writing an f32 N^2 slab and re-reading it for the cast).
    if jnp.dtype(a_hat_dtype) == jnp.dtype(jnp.bfloat16):
        scatter_dtype = jnp.bfloat16
    else:
        scatter_dtype = jnp.float32      # e.g. fp8: scatter f32 then cast
    a_hat = (
        jnp.zeros((npad_m, npad_k), scatter_dtype)
        .at[col, row].add(norm.astype(scatter_dtype))
    ).astype(a_hat_dtype)
    # TODO(synk): for large sparse graphs, replace the dense N^2 A_hat with a
    # block-sparse CSR path (PrefetchScalarGridSpec row pointers + gathers).

    # ---- XW = x @ W, kept as a bf16 [npad_k, h_pad] slab ----
    if c_in <= 512:
        # Tiny contraction: the MXU would sit ~idle, so a fused XLA matmul +
        # cast beats a Pallas launch (per perf review).
        x_pad = jnp.zeros((npad_k, c_in), jnp.float32).at[:n].set(x)
        w_pad = jnp.zeros((c_in, h_pad), jnp.float32).at[:, :h_dim].set(weight)
        xw = (x_pad @ w_pad).astype(jnp.bfloat16)
    else:
        c_pad = _round_up(c_in, 128)
        tc = min(512, c_pad)
        x_b = jnp.zeros((npad_k, c_pad), jnp.bfloat16).at[:n, :c_in].set(
            x.astype(jnp.bfloat16))
        w_b = jnp.zeros((c_pad, h_pad), jnp.bfloat16).at[:c_in, :h_dim].set(
            weight.astype(jnp.bfloat16))
        xw = pl.pallas_call(
            _xw_kernel,
            out_shape=jax.ShapeDtypeStruct((npad_k, h_pad), jnp.bfloat16),
            grid_spec=pltpu.PrefetchScalarGridSpec(
                num_scalar_prefetch=0,
                grid=(npad_k // tk, c_pad // tc),
                in_specs=[
                    pl.BlockSpec((tk, tc), lambda i, c: (i, c)),
                    pl.BlockSpec((tc, h_pad), lambda i, c: (c, 0)),
                ],
                out_specs=pl.BlockSpec((tk, h_pad), lambda i, c: (i, 0)),
                scratch_shapes=[pltpu.VMEM((tk, h_pad), jnp.float32)],
            ),
            compiler_params=pltpu.CompilerParams(
                dimension_semantics=("parallel", "arbitrary"),
                vmem_limit_bytes=budget,
            ),
        )(x_b, w_b)

    # Pad the bias with a large negative so padded features vanish in softmax.
    b_pad = jnp.full((1, h_pad), -1e30, jnp.float32).at[0, :h_dim].set(bias)

    # ---- kernel 2: tiled A_hat @ XW + bias, softmax over features ----
    grid_m = npad_m // tm
    grid_k = npad_k // tk

    if xw_resident:
        # Whole bf16 XW slab stays in VMEM (constant index_map -> fetched once).
        xw_spec = pl.BlockSpec((npad_k, h_pad), lambda i, k: (0, 0))
        xw_read = npad_k * h_pad * 2
    else:
        xw_spec = pl.BlockSpec((tk, h_pad), lambda i, k: (k, 0))
        xw_read = grid_m * npad_k * h_pad * 2

    cost = pl.CostEstimate(
        flops=2 * npad_m * npad_k * h_pad,
        transcendentals=npad_m * h_pad,
        bytes_accessed=(npad_m * npad_k * a_bytes     # A_hat stream
                        + xw_read                     # XW
                        + npad_m * h_pad * out_bytes  # output
                        + h_pad * 4),                 # bias
    )

    out = pl.pallas_call(
        _make_agg_softmax_kernel(xw_resident, tk),
        out_shape=jax.ShapeDtypeStruct((npad_m, h_pad), out_dtype),
        grid_spec=pltpu.PrefetchScalarGridSpec(
            num_scalar_prefetch=0,
            grid=(grid_m, grid_k),
            in_specs=[
                pl.BlockSpec((tm, tk), lambda i, k: (i, k)),
                xw_spec,
                pl.BlockSpec((1, h_pad), lambda i, k: (0, 0)),
            ],
            out_specs=pl.BlockSpec((tm, h_pad), lambda i, k: (i, 0)),
            scratch_shapes=[pltpu.VMEM((tm, h_pad), jnp.float32)],
        ),
        compiler_params=pltpu.CompilerParams(
            dimension_semantics=("parallel", "arbitrary"),
            vmem_limit_bytes=budget,
        ),
        cost_estimate=cost,
    )(a_hat, xw, b_pad)

    return out[:n, :h_dim]


def reference_jax(x, edge_index, edge_weight, weight, bias):
    n = x.shape[0]
    row, col = edge_index[0], edge_index[1]
    deg = jnp.zeros((n,), jnp.float32).at[col].add(edge_weight)
    dis = jnp.where(deg > 0, deg ** -0.5, 0.0)
    norm = dis[row] * edge_weight * dis[col]
    a_hat = jnp.zeros((n, n), jnp.float32).at[col, row].add(norm)
    h = a_hat @ (x @ weight) + bias
    return jax.nn.softmax(h, axis=1)


if __name__ == "__main__":
    key = jax.random.PRNGKey(0)
    k1, k2, k3, k4 = jax.random.split(key, 4)

    num_nodes = 200
    in_channels = 8
    hidden_channels = 32
    num_edges = 800

    # Deterministic node features
    x = jax.random.normal(k1, (num_nodes, in_channels), dtype=jnp.float32)

    # Deterministic synthetic graph (no self loops added by the conv)
    src = jax.random.randint(k2, (num_edges,), 0, num_nodes, dtype=jnp.int32)
    dst = (src + 1 + jax.random.randint(k3, (num_edges,), 0, num_nodes - 1,
                                        dtype=jnp.int32)) % num_nodes
    edge_index = jnp.stack([src, dst], axis=0)
    edge_weight = jax.random.uniform(k4, (num_edges,), dtype=jnp.float32,
                                     minval=0.1, maxval=1.0)

    # Deterministic parameters (GCNConv: Linear(in, hidden, bias=False) + bias)
    wkey, bkey = jax.random.split(jax.random.PRNGKey(42))
    weight = jax.random.normal(wkey, (in_channels, hidden_channels),
                               dtype=jnp.float32) * 0.1
    bias = jax.random.normal(bkey, (hidden_channels,), dtype=jnp.float32) * 0.01

    ref = reference_jax(x, edge_index, edge_weight, weight, bias)

    # Run 1: small explicit tiles so the toy problem exercises the (row, K)
    # grid, the f32 accumulator, and the resident-XW in-kernel pl.ds slicing.
    out_small = gcn_encoder_pallas(x, edge_index, edge_weight, weight, bias,
                                   tm=64, tk=128)
    out_small = jax.block_until_ready(out_small)

    # Run 2: auto-planned tiles / VMEM budget (production defaults).
    out_auto = gcn_encoder_pallas(x, edge_index, edge_weight, weight, bias)
    out_auto = jax.block_until_ready(out_auto)

    for out in (out_small, out_auto):
        assert out.shape == (num_nodes, hidden_channels)
        # bf16 A_hat / XW inside the kernel -> relaxed tolerance vs f32 ref.
        assert jnp.allclose(out, ref, atol=2e-2, rtol=0.0), "mismatch vs reference"
        assert jnp.allclose(jnp.sum(out, axis=1), 1.0, atol=1e-3), \
            "rows not normalized"

    print("KERNEL_OK")
</pallas_src>

<mosaic_0001>
module attributes {stable_mosaic.version = 11 : i64} {
  func.func @kernel(%arg0: i32, %arg1: i32, %arg2: memref<64x128xbf16, #tpu.memory_space<vmem>>, %arg3: memref<256x128xbf16, #tpu.memory_space<vmem>>, %arg4: memref<1x128xf32, #tpu.memory_space<vmem>>, %arg5: memref<64x128xf32, #tpu.memory_space<vmem>>, %arg6: memref<64x128xf32, #tpu.memory_space<vmem>>) attributes {dimension_semantics = [#tpu.dimension_semantics<parallel>, #tpu.dimension_semantics<arbitrary>], iteration_bounds = array<i64: 4, 2>, scalar_prefetch = 0 : i64, scratch_operands = 1 : i64, tpu.core_type = #tpu.core_type<tc>, window_params = [{transform_indices = @transform_0, window_bounds = array<i64: 64, 128>}, {pipeline_mode = #tpu.pipeline_mode<synchronous>, transform_indices = @transform_1, window_bounds = array<i64: 256, 128>}, {pipeline_mode = #tpu.pipeline_mode<synchronous>, transform_indices = @transform_2, window_bounds = array<i64: 1, 128>}, {transform_indices = @transform_3, window_bounds = array<i64: 64, 128>}]} {
    %c0_i32 = arith.constant 0 : i32
    %0 = arith.cmpi eq, %arg1, %c0_i32 : i32
    %1 = arith.extui %0 : i1 to i32
    %c0_i32_0 = arith.constant 0 : i32
    %2 = arith.cmpi ne, %1, %c0_i32_0 : i32
    scf.if %2 {
      %cst_8 = arith.constant 0.000000e+00 : f32
      %15 = vector.broadcast %cst_8 : f32 to vector<64x128xf32>
      %c0_9 = arith.constant 0 : index
      %c0_10 = arith.constant 0 : index
      %16 = vector.load %arg6[%c0_9, %c0_10] : memref<64x128xf32, #tpu.memory_space<vmem>>, vector<64x128xf32>
      tpu.vector_store %arg6[%c0_9, %c0_10], %15 {strides = array<i32>} : memref<64x128xf32, #tpu.memory_space<vmem>>, vector<64x128xf32>,
    } else {
    }
    %c128_i32 = arith.constant 128 : i32
    %3 = arith.muli %arg1, %c128_i32 : i32
    %4 = tpu.assume_multiple %3, 128 : i32
    %5 = arith.index_cast %4 : i32 to index
    %c0 = arith.constant 0 : index
    %6 = vector.load %arg3[%5, %c0] : memref<256x128xbf16, #tpu.memory_space<vmem>>, vector<128x128xbf16>
    %c0_1 = arith.constant 0 : index
    %c0_2 = arith.constant 0 : index
    %7 = vector.load %arg6[%c0_1, %c0_2] : memref<64x128xf32, #tpu.memory_space<vmem>>, vector<64x128xf32>
    %c0_3 = arith.constant 0 : index
    %c0_4 = arith.constant 0 : index
    %8 = vector.load %arg2[%c0_3, %c0_4] : memref<64x128xbf16, #tpu.memory_space<vmem>>, vector<64x128xbf16>
    %cst = arith.constant dense<0.000000e+00> : vector<64x128xf32>
    %9 = tpu.matmul %8, %6, %cst {dimension_numbers = #tpu.dot_dimension_numbers<[1], [0], [0], [1], [0, 0, 1, 1], [], []>} : vector<64x128xbf16>, vector<128x128xbf16>, vector<64x128xf32> -> vector<64x128xf32>
    %10 = arith.addf %7, %9 : vector<64x128xf32>
    %c0_5 = arith.constant 0 : index
    %c0_6 = arith.constant 0 : index
    %11 = vector.load %arg6[%c0_5, %c0_6] : memref<64x128xf32, #tpu.memory_space<vmem>>, vector<64x128xf32>
    tpu.vector_store %arg6[%c0_5, %c0_6], %10 {strides = array<i32>} : memref<64x128xf32, #tpu.memory_space<vmem>>, vector<64x128xf32>,
    %c1_i32 = arith.constant 1 : i32
    %12 = arith.cmpi eq, %arg1, %c1_i32 : i32
    %13 = arith.extui %12 : i1 to i32
    %c0_i32_7 = arith.constant 0 : i32
    %14 = arith.cmpi ne, %13, %c0_i32_7 : i32
    scf.if %14 {
      %c0_8 = arith.constant 0 : index
      %c0_9 = arith.constant 0 : index
      %15 = vector.load %arg6[%c0_8, %c0_9] : memref<64x128xf32, #tpu.memory_space<vmem>>, vector<64x128xf32>
      %c0_10 = arith.constant 0 : index
      %c0_11 = arith.constant 0 : index
      %16 = vector.load %arg4[%c0_10, %c0_11] : memref<1x128xf32, #tpu.memory_space<vmem>>, vector<1x128xf32>
      %17 = vector.broadcast %16 : vector<1x128xf32> to vector<64x128xf32>
      %18 = arith.addf %15, %17 : vector<64x128xf32>
      %cst_12 = arith.constant dense<0xFF800000> : vector<64xf32>
      %19 = vector.multi_reduction <maximumf>, %18, %cst_12 [1] : vector<64x128xf32> to vector<64xf32>
      %20 = vector.shape_cast %19 : vector<64xf32> to vector<64x1xf32>
      %21 = vector.broadcast %20 : vector<64x1xf32> to vector<64x128xf32>
      %22 = arith.subf %18, %21 : vector<64x128xf32>
      %23 = math.exp %22 : vector<64x128xf32>
      %cst_13 = arith.constant dense<0.000000e+00> : vector<64xf32>
      %24 = vector.multi_reduction <add>, %23, %cst_13 [1] : vector<64x128xf32> to vector<64xf32>
      %25 = vector.shape_cast %24 : vector<64xf32> to vector<64x1xf32>
      %26 = vector.broadcast %25 : vector<64x1xf32> to vector<64x128xf32>
      %27 = arith.divf %23, %26 : vector<64x128xf32>
      %c0_14 = arith.constant 0 : index
      %c0_15 = arith.constant 0 : index
      %28 = vector.load %arg5[%c0_14, %c0_15] : memref<64x128xf32, #tpu.memory_space<vmem>>, vector<64x128xf32>
      tpu.vector_store %arg5[%c0_14, %c0_15], %27 {strides = array<i32>} : memref<64x128xf32, #tpu.memory_space<vmem>>, vector<64x128xf32>,
    } else {
    }
    return
  }
  func.func @transform_0(%arg0: i32, %arg1: i32) -> (i32, i32) {
    %c0_i32 = arith.constant 0 : i32
    return %arg0, %arg1 : i32, i32
  }
  func.func @transform_1(%arg0: i32, %arg1: i32) -> (i32, i32) {
    %c0_i32 = arith.constant 0 : i32
    %c0_i32_0 = arith.constant 0 : i32
    %c0_i32_1 = arith.constant 0 : i32
    return %c0_i32, %c0_i32_0 : i32, i32
  }
  func.func @transform_2(%arg0: i32, %arg1: i32) -> (i32, i32) {
    %c0_i32 = arith.constant 0 : i32
    %c0_i32_0 = arith.constant 0 : i32
    %c0_i32_1 = arith.constant 0 : i32
    return %c0_i32, %c0_i32_0 : i32, i32
  }
  func.func @transform_3(%arg0: i32, %arg1: i32) -> (i32, i32) {
    %c0_i32 = arith.constant 0 : i32
    %c0_i32_0 = arith.constant 0 : i32
    return %arg0, %c0_i32 : i32, i32
  }
}

</mosaic_0001>

<bundles_post_ra>
// kernel: tpu_custom_call.1
= control target key start
LH: loop header
LB: loop body
LE: loop exit
PB: predicated region body
PF: predicated region fallthrough
CT: control target
= control target key end

     0   :  { %s1497_s0 = inlined_call_operand.hbm [shape: bf16[256,256], index: 0, kind: input, shape index: {}]   ;;  %s1498_s1 = inlined_call_operand.hbm [shape: bf16[256,128], index: 1, kind: input, shape index: {}]   ;;  %s1499_s2 = inlined_call_operand.vmem [shape: f32[1,128], index: 2, kind: input, shape index: {}]   ;;  %s1500_s3 = inlined_call_operand.hbm [shape: f32[256,128], index: 3, kind: output, shape index: {}]  }
   0x1   :  { %1510 = sst [smem:[#allocation18_spill]] %s1498_s1 }
   0x2   :  { %1511 = sst [smem:[#allocation19_spill]] %s1499_s2 }
   0x3   :  { %1512 = sst [smem:[#allocation20_spill]] %s1500_s3 }
   0x4   :  { %8 = vsyncpa [#allocation4], 0 }
   0x5   :  { %10 = vsyncpa [#allocation4 + $0x1], 0 }
   0x6   :  { %11 = vsyncpa [#allocation7], 0 }
   0x7   :  { %12 = vsyncpa [#allocation5], 0 }
   0x8   :  { %14 = vsyncpa [#allocation5 + $0x1], 0  ;;  %s1189_s12 = smov 0   ;;  %s1191_s13 = smov 0  }
   0x9   :  { %s1193_s14 = smov 0   ;;  %s1195_s15 = smov 0  }
   0xa   :  { %s1197_s16 = smov 0   ;;  %s1199_s17 = smov 0  }
   0xb   :  { %s1201_s18 = smov 0   ;;  %s1203_s19 = smov 0  }
   0xc   :  { %s1205_s20 = smov 0   ;;  %s1207_s21 = smov 0  }
   0xd   :  { %s1209_s22 = smov 0  }
   0xe LB: > { %1513 = sst [smem:[#allocation12_spill]] %s1120_s12  ;;  %s714_s23 = sadd.s32 4294967295, %s1160_s22   ;;  %s1160_s22 = sphi %s1209_s22, %s20_s22   ;;  %s1156_s21 = sphi %s1207_s21, %s1549_s21   ;;  %s1152_s20 = sphi %s1205_s20, %s1548_s20   ;;  %s1148_s19 = sphi %s1203_s19, %s1547_s19   ;;  %s1144_s18 = sphi %s1201_s18, %s1546_s18   ;;  %s1140_s17 = sphi %s1199_s17, %s1545_s17   ;;  %s1136_s16 = sphi %s1197_s16, %s1544_s16   ;;  %s1132_s15 = sphi %s1195_s15, %s1543_s15   ;;  %s1128_s14 = sphi %s1193_s14, %s1542_s14   ;;  %s1124_s13 = sphi %s1191_s13, %s1541_s13   ;;  %s1120_s12 = sphi %s1189_s12, %s1540_s12  }
   0xf   : > { %1514 = sst [smem:[#allocation13_spill]] %s1148_s19  ;;  %s715_s24 = sadd.s32 4294967294, %s1160_s22  }
  0x10   : > { %p54_p0 = scmp.ne.s32.totalorder %s1136_s16, %s1132_s15  ;;  %p1245_p1 = scmp.eq.s32.totalorder %s714_s23, 0 }
  0x11   : > { %p119_p2 = scmp.ne.s32.totalorder %s1128_s14, %s1124_s13  ;;  %p120_p3 = scmp.eq.s32.totalorder %s714_s23, 7 }
  0x12   : > { %p1253_p4 = por %p1245_p1, %p54_p0  ;;  %p125_p5 = scmp.ne.s32.totalorder %s1124_s13, %s1120_s12 }
  0x13   : > { %p1259_p6 = por %p120_p3, %p119_p2  ;;  %p126_p7 = scmp.eq.s32.totalorder %s715_s24, 7 }
  0x14   : > { %p716_p8 = scmp.ge.s32.totalorder %s1160_s22, 1  ;;  %p133_p9 = scmp.lt.s32.totalorder %s1160_s22, 9 }
  0x15   : > { %s1517_s27 = scalar_select %p1259_p6, 1, 0 }
  0x16   : > { %p1265_p10 = por %p126_p7, %p125_p5  ;;  %p1269_p11 = pnand %p716_p8, %p133_p9 }
  0x17   : > { %1518 = sst [smem:[#allocation14_spill]] %s1517_s27  ;;  %s1162_s6 = smov [#allocation6]  }
  0x18   : > { %s1519_s28 = scalar_select %p1265_p10, 1, 0 }
  0x19   : > { %s1522_s1 = sld [smem:[#allocation18_spill]]  ;;  %p830_p12 = pneg %p1269_p11 }
  0x1a   : > { %1520 = sst [smem:[#allocation15_spill]] %s1519_s28  ;;  %s146_s7 = sshll.u32 %s1162_s6, 4  ;;  %s147_s7 = int_to_ptr.vmem [resolvable:$true] %s146_s7 }
  0x1b   : > { %p831_p13 = pnand %p830_p12, %p1245_p1  ;;  %s1501_s8 = smov 64  }
  0x1c   : > { %s1502_s9 = smov 4   ;;  %s29_s10 = sadd.s32 1, %s1152_s20 }
  0x1d   : > { %s32_s11 = sadd.s32 1, %s1156_s21  ;;  %p30_p0 = scmp.ge.s32.totalorder %s29_s10, 2 }
  0x1e   : > { %s41_s15 = sadd.s32 1, %s1140_s17  ;;  %p48_p2 = scmp.ne.s32.totalorder %s1140_s17, %s1136_s16 }
  0x1f   : > { %s144_s5 = sshll.u32 %s1522_s1, 4  ;;  %p49_p3 = scmp.eq.s32.totalorder %s1160_s22, 0  ;;  %s145_s5 = int_to_ptr.hbm [resolvable:$true] %s144_s5 }
  0x20   : > { %833 = dma.hbm_to_vmem [thread:$0]  (!%p831_p13), %s145_s5, 2048, %s147_s7, [#allocation7], %s1501_s8, %s1501_s8, %s1502_s9  }
  0x21   : > { %s1551_s10 = smov (%p30_p0, %s29_s10), 0  ;;  %s1553_s11 = smov (!%p30_p0, %s32_s11), %s1156_s21 }
  0x22   : > { %1523 = sst [smem:[#allocation16_spill]] %s1551_s10  ;;  %s37_s23 = ssub.s32 %s1152_s20, %s1551_s10 }
  0x23   : > { %p1294_p5 = por %p49_p3, %p48_p2  ;;  %p34_p7 = scmp.ge.s32.totalorder %s1553_s11, 4 }
  0x24   : > { %s109_s30 = sadd.s32 1, %s1128_s14  ;;  %p843_p8 = scmp.lt.s32.totalorder %s1160_s22, 8 }
  0x25   : > { %s163_s4 = sand.u32 1, %s1140_s17   ;;  %s1555_s11 = smov (%p34_p7, %s1553_s11), 0 }
  0x26   : > { %1525 = sst [smem:[#allocation17_spill]] %s1555_s11  ;;  %s719_s5 = sshll.u32 %s163_s4, 5 }
  0x27   : > { %s36_s6 = ssub.s32 %s1156_s21, %s1555_s11  ;;  %s784_s8 = sshll.u32 %s1156_s21, 4 }
  0x28   : > { %s38_s7 = sor.u32 %s37_s23, %s36_s6  ;;  %p107_p9 = scmp.eq.s32.totalorder %s36_s6, 0 }
  0x29   : > { %p39_p12 = scmp.eq.s32.totalorder %s38_s7, 0  ;;  %s172_s10 = sadd.s32 %s1152_s20, %s784_s8 }
  0x2a   : > { %s1307_s9 = scalar_select %p107_p9, %s1128_s14, %s109_s30  }
  0x2b   : > { %s1310_s1 = scalar_select %p39_p12, %s1140_s17, %s41_s15  }
  0x2c   : > { %s167_s28 = scalar_lea.vmem [#allocation3], %s719_s5  ;;  %s722_s3 = sshll.u32 %s172_s10, 2 }
  0x2d   : > { %s177_s12 = sshll.u32 %s167_s28, 4  ;;  %s174_s2 = scalar_lea.hbm %s1497_s0, %s722_s3  ;;  %s178_s12 = int_to_ptr.vmem [resolvable:$true] %s177_s12 }
  0x2e   : > { %p835_p13 = pnand %p843_p8, %p1294_p5  ;;  %s175_s23 = sshll.u32 %s174_s2, 4  ;;  %s176_s23 = int_to_ptr.hbm [resolvable:$true] %s175_s23 }
  0x2f   : > { %s164_s6 = scalar_lea.sflag [#allocation4], %s163_s4  ;;  %s1165_s7 = smov 128  }
  0x30   : > { %s1526_s30 = smov 4   ;;  %s1527_s11 = smov 64  }
  0x31   : > { %837 = dma.hbm_to_vmem [thread:$0]  (!%p835_p13), %s176_s23, 512, %s178_s12, %s164_s6, %s1165_s7, %s1527_s11, %s1526_s30  }
  0x32   : > { %189 = sbr.rel (%p1269_p11) target bundleno = 569 (0x239), region = 32  ;;  %s191_s28 = sand.u32 (!%p1269_p11), 1, %s1136_s16  }
  0x33   : > { %s724_s8 = sshll.u32 (!%p1269_p11), %s191_s28, 5  ;;  %s192_s10 = scalar_lea.sflag (!%p1269_p11), [#allocation4], %s191_s28 }
  0x34   : > { %s1325_s19 = scalar_lea.vmem (!%p1269_p11), [#allocation3], %s724_s8 }
  0x37   : > { %1107 = dma.done.wait (%p1253_p4), %s192_s10, 512  }
  0x38   : > { %1109 = vsyncadd (%p1253_p4), %s192_s10, 4294966784 }
  0x39   : > { %1111 = dma.done.wait (%p1245_p1), [#allocation7], 2048  }
  0x3a   : > { %1113 = vsyncadd (%p1245_p1), [#allocation7], 4294965248  ;;  %s221_s2 = sand.u32 1, %s1124_s13   ;;  %p727_p11 = scmp.ne.s32.totalorder %s1144_s18, 0 }
  0x3b   : > { %s726_s3 = sshll.u32 %s221_s2, 6 }
  0x3c   : > { %s1338_s12 = scalar_lea.vmem [#allocation8], %s726_s3  ;;  %229 = sbr.rel (%p727_p11) target bundleno = 74 (0x4a), region = 44 }
  0x41   : > { %v1166_v0 = vmov 0.0  }
  0x42   : > { %230 = vst [vmem:[#allocation2 + $0x30] sm:$0xff] %v1166_v0 }
  0x43   : > { %231 = vst [vmem:[#allocation2] sm:$0xff] %v1166_v0 }
  0x44   : > { %232 = vst [vmem:[#allocation2 + $0x18] sm:$0xff] %v1166_v0 }
  0x45   : > { %233 = vst [vmem:[#allocation2 + $0x10] sm:$0xff] %v1166_v0 }
  0x46   : > { %234 = vst [vmem:[#allocation2 + $0x8] sm:$0xff] %v1166_v0 }
  0x47   : > { %235 = vst [vmem:[#allocation2 + $0x20] sm:$0xff] %v1166_v0 }
  0x48   : > { %236 = vst [vmem:[#allocation2 + $0x28] sm:$0xff] %v1166_v0 }
  0x49   : > { %237 = vst [vmem:[#allocation2 + $0x38] sm:$0xff] %v1166_v0 }
  0x4a PF: > { %s728_s25 = sshll.u32 %s1144_s18, 7  ;;  %v793_v9 = vld [vmem:[%s1325_s19] sm:$0xff]  ;;  %v794_v10 = vld [vmem:[%s1325_s19 + $0x8] sm:$0xff]  ;;  %v795_v11 = vld [vmem:[%s1325_s19 + $0x10] sm:$0xff]  ;;  %p778_p1 = scmp.ne.s32.totalorder %s1144_s18, 1 }
  0x4b   : > { %s239_s26 = sshra.s32 %s728_s25, 3  ;;  %v796_v12 = vld [vmem:[%s1325_s19 + $0x18] sm:$0xff]  ;;  %v259_v13 = vld [vmem:[#allocation2 + $0x30] sm:$0xff]  ;;  %v260_v21 = vld [vmem:[#allocation2] sm:$0xff]  ;;  %s1528_s24 = sld [smem:[#allocation19_spill]] (!%p778_p1) }
  0x4c   : > { %s729_s27 = sshll.u32 %s239_s26, 2  ;;  %v261_v14 = vld [vmem:[#allocation2 + $0x18] sm:$0xff]  ;;  %v262_v22 = vld [vmem:[#allocation2 + $0x10] sm:$0xff] }
  0x4d   : > { %s1342_s29 = scalar_lea.vmem [#allocation6], %s729_s27  ;;  %v263_v19 = vld [vmem:[#allocation2 + $0x8] sm:$0xff] }
  0x4e   : > { %v792_v1 = vld [vmem:[%s1342_s29 + $0x38] sm:$0xff]  ;;  %v791_v2 = vld [vmem:[%s1342_s29 + $0x30] sm:$0xff]  ;;  %v790_v3 = vld [vmem:[%s1342_s29 + $0x28] sm:$0xff] }
  0x4f   : > { %347 = vmatpush.bf16.msra.mxu0 %v792_v1  ;;  %798 = vmatpush.bf16.msra.mxu1 %v792_v1  ;;  %v789_v4 = vld [vmem:[%s1342_s29 + $0x20] sm:$0xff]  ;;  %v788_v5 = vld [vmem:[%s1342_s29 + $0x18] sm:$0xff]  ;;  %v787_v6 = vld [vmem:[%s1342_s29 + $0x10] sm:$0xff] }
  0x50   : > { %799 = vmatpush.bf16.msra.mxu2 %v792_v1  ;;  %800 = vmatpush.bf16.msra.mxu3 %v792_v1  ;;  %v786_v7 = vld [vmem:[%s1342_s29 + $0x8] sm:$0xff]  ;;  %v785_v8 = vld [vmem:[%s1342_s29] sm:$0xff]  ;;  %v266_v32 = vld [vmem:[#allocation2 + $0x38] sm:$0xff] }
  0x51   : > { %v265_v20 = vld [vmem:[#allocation2 + $0x28] sm:$0xff]  ;;  %v264_v31 = vld [vmem:[#allocation2 + $0x20] sm:$0xff] }
  0x53   : > { %348 = vmatpush.bf16.msra.mxu0 %v791_v2  ;;  %801 = vmatpush.bf16.msra.mxu1 %v791_v2 }
  0x54   : > { %802 = vmatpush.bf16.msra.mxu2 %v791_v2  ;;  %803 = vmatpush.bf16.msra.mxu3 %v791_v2 }
  0x57   : > { %349 = vmatpush.bf16.msra.mxu0 %v790_v3  ;;  %804 = vmatpush.bf16.msra.mxu1 %v790_v3 }
  0x58   : > { %805 = vmatpush.bf16.msra.mxu2 %v790_v3  ;;  %806 = vmatpush.bf16.msra.mxu3 %v790_v3 }
  0x5b   : > { %350 = vmatpush.bf16.msra.mxu0 %v789_v4  ;;  %807 = vmatpush.bf16.msra.mxu1 %v789_v4 }
  0x5c   : > { %808 = vmatpush.bf16.msra.mxu2 %v789_v4  ;;  %809 = vmatpush.bf16.msra.mxu3 %v789_v4 }
  0x5f   : > { %351 = vmatpush.bf16.msra.mxu0 %v788_v5  ;;  %810 = vmatpush.bf16.msra.mxu1 %v788_v5 }
  0x60   : > { %811 = vmatpush.bf16.msra.mxu2 %v788_v5  ;;  %812 = vmatpush.bf16.msra.mxu3 %v788_v5 }
  0x63   : > { %352 = vmatpush.bf16.msra.mxu0 %v787_v6  ;;  %813 = vmatpush.bf16.msra.mxu1 %v787_v6 }
  0x64   : > { %814 = vmatpush.bf16.msra.mxu2 %v787_v6  ;;  %815 = vmatpush.bf16.msra.mxu3 %v787_v6 }
  0x67   : > { %353 = vmatpush.bf16.msra.mxu0 %v786_v7  ;;  %816 = vmatpush.bf16.msra.mxu1 %v786_v7 }
  0x68   : > { %817 = vmatpush.bf16.msra.mxu2 %v786_v7  ;;  %818 = vmatpush.bf16.msra.mxu3 %v786_v7 }
  0x6b   : > { %354 = vmatpush.bf16.msra.mxu0 %v785_v8  ;;  %819 = vmatpush.bf16.msra.mxu1 %v785_v8 }
  0x6c   : > { %820 = vmatpush.bf16.msra.mxu2 %v785_v8  ;;  %821 = vmatpush.bf16.msra.mxu3 %v785_v8 }
  0x6e   : > { %355 = vmatmul.bf16.vlgmr.msra.gmra.mxu0 %v793_v9  ;;  %360 = vmatmul.bf16.vlgmr.msra.gmra.mxu1 %v794_v10 }
  0x6f   : > { %365 = vmatmul.bf16.vlgmr.msra.gmra.mxu2 %v795_v11  ;;  %370 = vmatmul.bf16.vlgmr.msra.gmra.mxu3 %v796_v12 }
  0xeb   : > { %v356_v15 = vpop.f32.mrf.mxu0  ;;  %v361_v16 = vpop.f32.mrf.mxu1 }
  0xec   : > { %v376_v17 = vadd.f32 %v356_v15, %v259_v13  ;;  %v378_v18 = vadd.f32 %v361_v16, %v261_v14 }
  0xee   : > { %384 = vst [vmem:[#allocation2 + $0x30] sm:$0xff] %v376_v17 }
  0xef   : > { %386 = vst [vmem:[#allocation2 + $0x18] sm:$0xff] %v378_v18 }
  0xf2   : > { %v366_v23 = vpop.f32.mrf.mxu2  ;;  %v371_v24 = vpop.f32.mrf.mxu3 }
  0xf3   : > { %v380_v25 = vadd.f32 %v366_v23, %v263_v19  ;;  %v382_v26 = vadd.f32 %v371_v24, %v265_v20  ;;  %v358_v27 = vpop.f32.mrf.mxu0  ;;  %v363_v28 = vpop.f32.mrf.mxu1 }
  0xf4   : > { %v377_v29 = vadd.f32 %v358_v27, %v260_v21  ;;  %v379_v30 = vadd.f32 %v363_v28, %v262_v22 }
  0xf5   : > { %388 = vst [vmem:[#allocation2 + $0x8] sm:$0xff] %v380_v25 }
  0xf6   : > { %390 = vst [vmem:[#allocation2 + $0x28] sm:$0xff] %v382_v26 }
  0xf7   : > { %385 = vst [vmem:[#allocation2] sm:$0xff] %v377_v29 }
  0xf8   : > { %387 = vst [vmem:[#allocation2 + $0x10] sm:$0xff] %v379_v30 }
  0xfa   : > { %v368_v33 = vpop.f32.mrf.mxu2  ;;  %v373_v34 = vpop.f32.mrf.mxu3  ;;  %395 = sbr.rel (%p778_p1) target bundleno = 547 (0x223), region = 48 }
  0xfb   : > { %v381_v35 = vadd.f32 %v368_v33, %v264_v31  ;;  %v383_v36 = vadd.f32 %v373_v34, %v266_v32 }
  0xfd   : > { %389 = vst [vmem:[#allocation2 + $0x20] sm:$0xff] %v381_v35 }
  0xfe   : > { %391 = vst [vmem:[#allocation2 + $0x38] sm:$0xff] %v383_v36 }
  0xff   : > { %v400_v37 = vld [vmem:[#allocation2 + $0x8] sm:$0xff]  ;;  %v941_v38 = vld [vmem:[%s1528_s24] ss:$0 sm:$0xff]  ;;  %v398_v39 = vld [vmem:[#allocation2 + $0x18] sm:$0xff] }
 0x100   : > { %v396_v40 = vld [vmem:[#allocation2 + $0x30] sm:$0xff]  ;;  %v412_v41 = vadd.f32 %v941_v38, %v400_v37  ;;  %v410_v42 = vadd.f32 %v941_v38, %v398_v39  ;;  %v397_v46 = vld [vmem:[#allocation2] sm:$0xff]  ;;  %v402_v51 = vld [vmem:[#allocation2 + $0x28] sm:$0xff] }
 0x101   : > { %v408_v43 = vadd.f32 %v941_v38, %v396_v40  ;;  %v399_v45 = vld [vmem:[#allocation2 + $0x10] sm:$0xff]  ;;  %v409_v49 = vadd.f32 %v941_v38, %v397_v46  ;;  %v414_v53 = vadd.f32 %v941_v38, %v402_v51 }
 0x102   : > { %424 = vmax.xlane.f32.xlu2 %v412_v41  ;;  %420 = vmax.xlane.f32.xlu1 %v410_v42  ;;  %v411_v48 = vadd.f32 %v941_v38, %v399_v45 }
 0x103   : > { %416 = vmax.xlane.f32.xlu0 %v408_v43 }
 0x104   : > { %v401_v44 = vld [vmem:[#allocation2 + $0x20] sm:$0xff] }
 0x105   : > { %v413_v47 = vadd.f32 %v941_v38, %v401_v44  ;;  %v403_v50 = vld [vmem:[#allocation2 + $0x38] sm:$0xff] }
 0x106   : > { %v415_v52 = vadd.f32 %v941_v38, %v403_v50 }
 0x10a   : > { %426 = vmax.xlane.f32.xlu2 %v413_v47  ;;  %422 = vmax.xlane.f32.xlu1 %v411_v48 }
 0x10b   : > { %418 = vmax.xlane.f32.xlu0 %v409_v49 }
 0x112   : > { %430 = vmax.xlane.f32.xlu1 %v415_v52 }
 0x113   : > { %428 = vmax.xlane.f32.xlu0 %v414_v53 }
 0x175   : > { %v425_v54 = vpop.xlane.xlu2 %424  ;;  %v421_v55 = vpop.xlane.xlu1 %420 }
 0x176   : > { %v434_v56 = vsub.f32 %v410_v42, %v421_v55  ;;  %v417_v57 = vpop.xlane.xlu0 %416  ;;  %v436_v8 = vsub.f32 %v412_v41, %v425_v54 }
 0x177   : > { %v432_v58 = vsub.f32 %v408_v43, %v417_v57 }
 0x178   : > { %v444_v59 = vmul.f32 1.442695, %v434_v56  ;;  %v448_v9 = vmul.f32 1.442695, %v436_v8 }
 0x179   : > { %v440_v60 = vmul.f32 1.442695, %v432_v58 }
 0x17a   : > { %942 = vpow2.f32 %v444_v59 }
 0x17b   : > { %944 = vpow2.f32 %v440_v60 }
 0x17d   : > { %v427_v61 = vpop.xlane.xlu2 %426  ;;  %v423_v62 = vpop.xlane.xlu1 %422 }
 0x17e   : > { %v437_v63 = vsub.f32 %v413_v47, %v427_v61  ;;  %v435_v0 = vsub.f32 %v411_v48, %v423_v62  ;;  %v419_v1 = vpop.xlane.xlu0 %418 }
 0x17f   : > { %v433_v2 = vsub.f32 %v409_v49, %v419_v1 }
 0x180   : > { %v450_v3 = vmul.f32 1.442695, %v437_v63  ;;  %v446_v4 = vmul.f32 1.442695, %v435_v0  ;;  %v1360_v5 = vpop.eup %942 }
 0x181   : > { %v442_v6 = vmul.f32 1.442695, %v433_v2  ;;  %v1362_v7 = vpop.eup %944  ;;  %460 = vadd.xlane.f32.xlu1 %v1360_v5 }
 0x182   : > { %946 = vpow2.f32 %v450_v3  ;;  %456 = vadd.xlane.f32.xlu2 %v1362_v7 }
 0x183   : > { %948 = vpow2.f32 %v446_v4 }
 0x184   : > { %950 = vpow2.f32 %v442_v6 }
 0x185   : > { %v431_v12 = vpop.xlane.xlu1 %430  ;;  %952 = vpow2.f32 %v448_v9 }
 0x186   : > { %v429_v10 = vpop.xlane.xlu0 %428  ;;  %v439_v17 = vsub.f32 %v415_v52, %v431_v12 }
 0x187   : > { %v438_v11 = vsub.f32 %v414_v53, %v429_v10 }
 0x188   : > { %v1366_v13 = vpop.eup %946  ;;  %v454_v18 = vmul.f32 1.442695, %v439_v17 }
 0x189   : > { %v1368_v14 = vpop.eup %948  ;;  %v452_v15 = vmul.f32 1.442695, %v438_v11  ;;  %466 = vadd.xlane.f32.xlu1 %v1366_v13 }
 0x18a   : > { %v1370_v16 = vpop.eup %950  ;;  %462 = vadd.xlane.f32.xlu2 %v1368_v14 }
 0x18b   : > { %954 = vpow2.f32 %v452_v15  ;;  %458 = vadd.xlane.f32.xlu0 %v1370_v16  ;;  %v1375_v19 = vpop.eup %952 }
 0x18c   : > { %956 = vpow2.f32 %v454_v18 }
 0x191   : > { %v1377_v20 = vpop.eup %954 }
 0x192   : > { %468 = vadd.xlane.f32.xlu2 %v1377_v20  ;;  %v1381_v21 = vpop.eup %956 }
 0x193   : > { %464 = vadd.xlane.f32.xlu0 %v1375_v19 }
 0x19b   : > { %470 = vadd.xlane.f32.xlu0 %v1381_v21 }
 0x1f4   : > { %v461_v22 = vpop.xlane.xlu1 %460 }
 0x1f5   : > { %958 = vrcp.f32 %v461_v22  ;;  %v457_v23 = vpop.xlane.xlu2 %456  ;;  %v511_v32 = vand.u32 2147483647, %v461_v22  ;;  %v513_v33 = vand.u32 2147483648, %v461_v22  ;;  %vm507_vm0 = vweird.f32 %v461_v22 }
 0x1f6   : > { %960 = vrcp.f32 %v457_v23  ;;  %v481_v35 = vand.u32 2147483647, %v457_v23  ;;  %v483_v36 = vand.u32 2147483648, %v457_v23  ;;  %vm477_vm4 = vweird.f32 %v457_v23 }
 0x1f7   : > { %vm512_vm3 = vcmp.eq.f32.partialorder %v511_v32, 8.507059e+37  ;;  %v514_v40 = vor.u32 1.1754944e-38, %v513_v33 }
 0x1f8   : > { %vm1390_vm6 = vcmp.eq.f32.partialorder %v481_v35, 8.507059e+37  ;;  %v484_v44 = vor.u32 1.1754944e-38, %v483_v36 }
 0x1fb   : > { %v959_v24 = vpop.eup %958 }
 0x1fc   : > { %v961_v25 = vpop.eup %960  ;;  %v503_v26 = vmul.f32 %v959_v24, %v461_v22  ;;  %v467_v27 = vpop.xlane.xlu1 %466  ;;  %vm508_vm1 = vweird.f32 %v959_v24 }
 0x1fd   : > { %v473_v28 = vmul.f32 %v961_v25, %v457_v23  ;;  %962 = vrcp.f32 %v467_v27  ;;  %v1384_v29 = vpop.xlane.xlu2 %462  ;;  %vm478_vm2 = vweird.f32 %v961_v25  ;;  %vm509_vm5 = vmor %vm507_vm0, %vm508_vm1  ;;  %vm552_vm7 = vweird.f32 %v467_v27 }
 0x1fe   : > { %v1386_v30 = vpop.xlane.xlu0 %458  ;;  %v504_v31 = vsub.f32 1.0, %v503_v26  ;;  %964 = vrcp.f32 %v1384_v29  ;;  %vm479_vm8 = vmor %vm477_vm4, %vm478_vm2  ;;  %v556_v48 = vand.u32 2147483647, %v467_v27  ;;  %v558_v49 = vand.u32 2147483648, %v467_v27 }
 0x1ff   : > { %v474_v34 = vsub.f32 1.0, %v473_v28  ;;  %966 = vrcp.f32 %v1386_v30  ;;  %vm522_vm9 = vweird.f32 %v1384_v29  ;;  %v526_v61 = vand.u32 2147483647, %v1384_v29 }
 0x200   : > { %v505_v37 = vmul.f32 %v959_v24, %v504_v31  ;;  %v559_v0 = vor.u32 1.1754944e-38, %v558_v49  ;;  %v528_v1 = vand.u32 2147483648, %v1384_v29  ;;  %vm557_vm13 = vcmp.eq.f32.partialorder %v556_v48, 8.507059e+37 }
 0x201   : > { %v475_v38 = vmul.f32 %v961_v25, %v474_v34  ;;  %v498_v6 = vand.u32 2147483648, %v1386_v30  ;;  %v496_v9 = vand.u32 2147483647, %v1386_v30  ;;  %vm527_vm0 = vcmp.eq.f32.partialorder %v526_v61, 8.507059e+37 }
 0x202   : > { %v506_v39 = vadd.f32 %v959_v24, %v505_v37  ;;  %v529_v11 = vor.u32 1.1754944e-38, %v528_v1  ;;  %vm492_vm1 = vweird.f32 %v1386_v30 }
 0x203   : > { %v963_v41 = vpop.eup %962  ;;  %v476_v42 = vadd.f32 %v961_v25, %v475_v38 }
 0x204   : > { %v965_v45 = vpop.eup %964  ;;  %v510_v46 = vsel %vm509_vm5, %v959_v24, %v506_v39  ;;  %v548_v47 = vmul.f32 %v963_v41, %v467_v27  ;;  %vm553_vm10 = vweird.f32 %v963_v41 }
 0x205   : > { %v515_v50 = vsel %vm512_vm3, %v514_v40, %v510_v46  ;;  %v480_v51 = vsel %vm479_vm8, %v961_v25, %v476_v42  ;;  %v518_v52 = vmul.f32 %v965_v45, %v1384_v29  ;;  %v1396_v53 = vpop.xlane.xlu2 %468  ;;  %v967_v55 = vpop.eup %966  ;;  %vm1411_vm11 = vmor %vm552_vm7, %vm553_vm10  ;;  %vm523_vm12 = vweird.f32 %v965_v45 }
 0x206   : > { %v1398_v54 = vpop.xlane.xlu0 %464  ;;  %v516_v56 = vmul.f32 %v1360_v5, %v515_v50  ;;  %v485_v57 = vsel %vm1390_vm6, %v484_v44, %v480_v51  ;;  %v549_v58 = vsub.f32 1.0, %v548_v47  ;;  %v488_v62 = vmul.f32 %v967_v55, %v1386_v30  ;;  %vm524_vm15 = vmor %vm522_vm9, %vm523_vm12 }
 0x207   : > { %v486_v59 = vmul.f32 %v1362_v7, %v485_v57  ;;  %v519_v60 = vsub.f32 1.0, %v518_v52  ;;  %968 = vrcp.f32 %v1396_v53  ;;  %vm493_vm14 = vweird.f32 %v967_v55 }
 0x208   : > { %594 = vst [vmem:[%s1338_s12 + $0x10] sm:$0xff] %v516_v56  ;;  %v550_v63 = vmul.f32 %v963_v41, %v549_v58  ;;  %v489_v4 = vsub.f32 1.0, %v488_v62  ;;  %970 = vrcp.f32 %v1398_v54  ;;  %vm494_vm2 = vmor %vm492_vm1, %vm493_vm14  ;;  %v499_v25 = vor.u32 1.1754944e-38, %v498_v6 }
 0x209   : > { %592 = vst [vmem:[%s1338_s12] sm:$0xff] %v486_v59  ;;  %v520_v3 = vmul.f32 %v965_v45, %v519_v60  ;;  %vm497_vm3 = vcmp.eq.f32.partialorder %v496_v9, 8.507059e+37  ;;  %vm567_vm4 = vweird.f32 %v1396_v53  ;;  %v571_v33 = vand.u32 2147483647, %v1396_v53 }
 0x20a   : > { %v551_v5 = vadd.f32 %v963_v41, %v550_v63  ;;  %v490_v8 = vmul.f32 %v967_v55, %v489_v4  ;;  %v573_v34 = vand.u32 2147483648, %v1396_v53  ;;  %v541_v36 = vand.u32 2147483647, %v1398_v54 }
 0x20b   : > { %v521_v7 = vadd.f32 %v965_v45, %v520_v3  ;;  %v543_v37 = vand.u32 2147483648, %v1398_v54  ;;  %vm572_vm8 = vcmp.eq.f32.partialorder %v571_v33, 8.507059e+37  ;;  %vm537_vm9 = vweird.f32 %v1398_v54 }
 0x20c   : > { %v555_v10 = vsel %vm1411_vm11, %v963_v41, %v551_v5  ;;  %v491_v17 = vadd.f32 %v967_v55, %v490_v8  ;;  %v574_v41 = vor.u32 1.1754944e-38, %v573_v34  ;;  %vm542_vm11 = vcmp.eq.f32.partialorder %v541_v36, 8.507059e+37 }
 0x20d   : > { %v560_v12 = vsel %vm557_vm13, %v559_v0, %v555_v10  ;;  %v525_v15 = vsel %vm524_vm15, %v965_v45, %v521_v7  ;;  %v969_v22 = vpop.eup %968  ;;  %v544_v44 = vor.u32 1.1754944e-38, %v543_v37 }
 0x20e   : > { %v471_v18 = vpop.xlane.xlu0 %470  ;;  %v561_v23 = vmul.f32 %v1366_v13, %v560_v12  ;;  %v530_v24 = vsel %vm527_vm0, %v529_v11, %v525_v15  ;;  %v971_v26 = vpop.eup %970  ;;  %v495_v28 = vsel %vm494_vm2, %v967_v55, %v491_v17  ;;  %v563_v29 = vmul.f32 %v969_v22, %v1396_v53 }
 0x20f   : > { %972 = vrcp.f32 %v471_v18  ;;  %v531_v27 = vmul.f32 %v1368_v14, %v530_v24  ;;  %v500_v31 = vsel %vm497_vm3, %v499_v25, %v495_v28  ;;  %v533_v30 = vmul.f32 %v971_v26, %v1398_v54 }
 0x210   : > { %597 = vst [vmem:[%s1338_s12 + $0x28] sm:$0xff] %v561_v23  ;;  %v501_v32 = vmul.f32 %v1370_v16, %v500_v31  ;;  %v564_v13 = vsub.f32 1.0, %v563_v29  ;;  %vm568_vm5 = vweird.f32 %v969_v22  ;;  %vm538_vm6 = vweird.f32 %v971_v26 }
 0x211   : > { %595 = vst [vmem:[%s1338_s12 + $0x18] sm:$0xff] %v531_v27  ;;  %v534_v35 = vsub.f32 1.0, %v533_v30  ;;  %vm569_vm7 = vmor %vm567_vm4, %vm568_vm5  ;;  %v586_v48 = vand.u32 2147483647, %v471_v18  ;;  %v588_v49 = vand.u32 2147483648, %v471_v18  ;;  %vm582_vm13 = vweird.f32 %v471_v18 }
 0x212   : > { %593 = vst [vmem:[%s1338_s12 + $0x8] sm:$0xff] %v501_v32  ;;  %v565_v14 = vmul.f32 %v969_v22, %v564_v13  ;;  %vm539_vm10 = vmor %vm537_vm9, %vm538_vm6 }
 0x213   : > { %v535_v39 = vmul.f32 %v971_v26, %v534_v35  ;;  %v589_v55 = vor.u32 1.1754944e-38, %v588_v49  ;;  %vm587_vm15 = vcmp.eq.f32.partialorder %v586_v48, 8.507059e+37 }
 0x214   : > { %v566_v40 = vadd.f32 %v969_v22, %v565_v14 }
 0x215   : > { %v973_v38 = vpop.eup %972  ;;  %v536_v42 = vadd.f32 %v971_v26, %v535_v39 }
 0x216   : > { %v578_v16 = vmul.f32 %v973_v38, %v471_v18  ;;  %v570_v43 = vsel %vm569_vm7, %v969_v22, %v566_v40  ;;  %vm583_vm12 = vweird.f32 %v973_v38 }
 0x217   : > { %v575_v46 = vsel %vm572_vm8, %v574_v41, %v570_v43  ;;  %v540_v47 = vsel %vm539_vm10, %v971_v26, %v536_v42  ;;  %vm584_vm14 = vmor %vm582_vm13, %vm583_vm12 }
 0x218   : > { %v579_v45 = vsub.f32 1.0, %v578_v16  ;;  %v576_v50 = vmul.f32 %v1377_v20, %v575_v46  ;;  %v545_v51 = vsel %vm542_vm11, %v544_v44, %v540_v47 }
 0x219   : > { %v546_v53 = vmul.f32 %v1375_v19, %v545_v51 }
 0x21a   : > { %v580_v52 = vmul.f32 %v973_v38, %v579_v45  ;;  %598 = vst [vmem:[%s1338_s12 + $0x30] sm:$0xff] %v576_v50 }
 0x21b   : > { %596 = vst [vmem:[%s1338_s12 + $0x20] sm:$0xff] %v546_v53 }
 0x21c   : > { %v581_v54 = vadd.f32 %v973_v38, %v580_v52 }
 0x21e   : > { %v585_v56 = vsel %vm584_vm14, %v973_v38, %v581_v54 }
 0x21f   : > { %v590_v57 = vsel %vm587_vm15, %v589_v55, %v585_v56 }
 0x220   : > { %v591_v58 = vmul.f32 %v1381_v21, %v590_v57 }
 0x222   : > { %599 = vst [vmem:[%s1338_s12 + $0x38] sm:$0xff] %v591_v58 }
 0x223 PF: > { %s1533_s18 = sld [smem:[#allocation13_spill]]  ;;  %s613_s28 = sshll.u32 %s1338_s12, 4  ;;  %s614_s28 = int_to_ptr.vmem [resolvable:$true] %s613_s28 }
 0x224   : > { %s1535_s7 = sld [smem:[#allocation20_spill]]  ;;  %s601_s10 = scalar_lea.sflag [#allocation5], %s221_s2 }
 0x229   : > { %s797_s5 = sshll.u32 %s1533_s18, 6 }
 0x22a   : > { %s612_s30 = scalar_lea.hbm %s1535_s7, %s797_s5  ;;  %s1054_s27 = scalar_lea.hbm %s1535_s7, 256 }
 0x22b   : > { %s615_s8 = sshll.u32 %s612_s30, 4  ;;  %s616_s8 = int_to_ptr.hbm [resolvable:$true] %s615_s8 }
 0x22c   : > { %s1048_s19 = sshra.s32 %s616_s8, 4  ;;  %s1049_s19 = int_to_ptr.hbm [resolvable:$true] %s1048_s19 }
 0x22d   : > { %s1050_s3 = scalar_lea.hbm %s1049_s19, 64  ;;  %p1055_p3 = scmp.lt.s32.totalorder %s1049_s19, %s1535_s7 }
 0x22e   : > { %p1051_p4 = scmp.ne.s32.totalorder %s1049_s19, %s1050_s3  ;;  %p1056_p5 = scmp.lt.s32.totalorder %s1054_s27, %s1050_s3 }
 0x230   : > { %p1052_p0 = pnand %p1051_p4, %p1259_p6  ;;  %p1057_p7 = por %p1056_p5, %p1055_p3 }
 0x232   : > { %p1053_p2 = pneg %p1052_p0 }
 0x234   : > { %p1058_p8 = pnand %p1057_p7, %p1053_p2 }
 0x236   : > { %1061 = shalt.err (!%p1058_p8)
}
 0x237   : > { %s1167_s2 = smov 128   ;;  %s1168_s12 = smov 8  }
 0x238   : > { %828 = dma.vmem_to_hbm [thread:$0]  (%p1259_p6), %s614_s28, 1024, %s616_s8, %s601_s10, %s1167_s2, %s1167_s2, %s1168_s12  }
 0x239 PF: > { %s1536_s15 = sld [smem:[#allocation12_spill]]  ;;  %p845_p9 = scmp.ge.s32.totalorder %s1160_s22, 2 }
 0x23b   : > { %p839_p12 = pnand %p845_p9, %p1265_p10 }
 0x23d   : > { %p840_p13 = pneg %p839_p12 }
 0x23f   : > { %s630_s18 = sand.u32 1, %s1536_s15  }
 0x240   : > { %s631_s5 = scalar_lea.sflag [#allocation5], %s630_s18 }
 0x241   : > { %1115 = dma.done.wait (%p840_p13), %s631_s5, 1024  }
 0x242   : > { %1117 = vsyncadd (%p840_p13), %s631_s5, 4294966272  ;;  %s20_s22 = sadd.s32 1, %s1160_s22   ;;  %s1538_s4 = sld [smem:[#allocation16_spill]] }
 0x243   : > { %p17_p11 = scmp.ge.s32.totalorder %s20_s22, 10   ;;  %s1539_s23 = sld [smem:[#allocation17_spill]] }
 0x244   : > { %s1540_s12 = smov %s1124_s13  ;;  %s1541_s13 = smov %s1128_s14 }
 0x245   : > { %s1542_s14 = smov %s1307_s9  ;;  %s1543_s15 = smov %s1136_s16 }
 0x246   : > { %s1544_s16 = smov %s1140_s17  ;;  %s1545_s17 = smov %s1310_s1 }
 0x247   : > { %s1546_s18 = smov %s1152_s20  ;;  %s1547_s19 = smov %s1156_s21 }
 0x248   : > { %s1548_s20 = smov %s1538_s4  ;;  %19 = sbr.rel (!%p17_p11) target bundleno = 14 (0xe), region = 90 }
 0x249   : > { %s1549_s21 = smov %s1539_s23 }
 0x24d   :  { %637 = vsyncpa [#allocation4], 1 }
 0x24e   :  { %639 = vsyncpa [#allocation4 + $0x1], 1 }
 0x24f   :  { %640 = vsyncpa [#allocation7], 1 }
 0x250   :  { %641 = vsyncpa [#allocation5], 1 }
 0x251   :  { %643 = vsyncpa [#allocation5 + $0x1], 1 }

</bundles_post_ra>
